<compile_context>
chip_gen: v5e
topology: v5e:2x2
jax: 0.10.0
libtpu: 0.0.40
codegen_flags: <defaults>
</compile_context>

<pallas_src>
import jax
import jax.numpy as jnp
from jax.experimental import pallas as pl
from jax.experimental.pallas import tpu as pltpu


_LANE = 128     # vreg lane width
_SUBLANE = 8    # vreg sublane count (f32)


def _round_up(x, m):
    return (x + m - 1) // m * m


def _pad_to(x, shape):
    pads = [(0, t - s) for s, t in zip(x.shape, shape)]
    if all(p == (0, 0) for p in pads):
        return x
    return jnp.pad(x, pads)


def _wgen_kernel(z_ref,
                 w1_ref, b1_ref,
                 w2_ref, b2_ref,
                 w3_ref, b3_ref,
                 w4_ref, b4_ref,
                 out_ref):
    """Fused MLP forward for one batch tile: ((fc→leaky)×3 → fc → tanh) * 2."""
    neg_slope = jnp.float32(0.01)  # PyTorch nn.LeakyReLU default

    def leaky(x):
        return jnp.where(x >= 0, x, neg_slope * x)

    mm_dtype = w1_ref.dtype  # matmul-input dtype (bf16); accumulation stays f32

    # z arrives unpadded f32 straight from HBM; cast to bf16 only for the MXU.
    h = jnp.dot(z_ref[...].astype(mm_dtype), w1_ref[...],
                preferred_element_type=jnp.float32) + b1_ref[...]
    h = leaky(h)
    h = jnp.dot(h.astype(mm_dtype), w2_ref[...],
                preferred_element_type=jnp.float32) + b2_ref[...]
    h = leaky(h)
    h = jnp.dot(h.astype(mm_dtype), w3_ref[...],
                preferred_element_type=jnp.float32) + b3_ref[...]
    h = leaky(h)
    h = jnp.dot(h.astype(mm_dtype), w4_ref[...],
                preferred_element_type=jnp.float32) + b4_ref[...]
    # Elementwise stays f32 (safe on v5e's f32-only VPU/EUP); out_dim == full
    # array dim so this store targets the real, unpadded output.
    out_ref[...] = (2.0 * jnp.tanh(h)).astype(out_ref.dtype)


def prepare_params(params, *, compute_dtype=jnp.bfloat16):
    """One-time padding + dtype cast of weights/biases (hoisted out of the
    per-call path).  Hidden dims are lane-padded to 128; the z input dim and
    the output dim stay UNPADDED so z/out HBM traffic is the real data only.
    NOTE(v6e/v7x): if real hidden dims grow to >=2K, pad to 256 (MXU width)
    instead — pointless at these toy 32-wide layers."""
    z_dim, d1 = params["w1"].shape
    d2 = params["w2"].shape[1]
    d3 = params["w3"].shape[1]
    out_dim = params["w4"].shape[1]
    d1p = _round_up(d1, _LANE)
    d2p = _round_up(d2, _LANE)
    d3p = _round_up(d3, _LANE)
    return dict(
        w1=_pad_to(params["w1"], (z_dim, d1p)).astype(compute_dtype),
        b1=_pad_to(params["b1"], (1, d1p)).astype(jnp.float32),
        w2=_pad_to(params["w2"], (d1p, d2p)).astype(compute_dtype),
        b2=_pad_to(params["b2"], (1, d2p)).astype(jnp.float32),
        w3=_pad_to(params["w3"], (d2p, d3p)).astype(compute_dtype),
        b3=_pad_to(params["b3"], (1, d3p)).astype(jnp.float32),
        w4=_pad_to(params["w4"], (d3p, out_dim)).astype(compute_dtype),
        b4=params["b4"].astype(jnp.float32),
    )


def wgen_forward(z, prepared, *, block_b=2048):
    """Run the Wgen forward pass with a fused, batch-tiled Pallas kernel.

    z: [B, Z_dim] float32 (unpadded, f32 — cast happens in-kernel)
    prepared: output of prepare_params() (padded, bf16 weights / f32 biases).
    Returns [B, out_dim] float32.
    """
    B, z_dim = z.shape
    assert B > 0, "empty batch"
    d1p = prepared["w1"].shape[1]
    d2p = prepared["w2"].shape[1]
    d3p = prepared["w3"].shape[1]
    out_dim = prepared["w4"].shape[1]

    # Batch tile: multiple of 8 sublanes, large (amortizes per-grid-step
    # overhead), but capped at ceil(B/2) so large batches produce >=2 grid
    # steps and both v7x TensorCores get work (harmless on v5e/v6e).
    tm = min(block_b, max(_SUBLANE, _round_up(pl.cdiv(B, 2), _SUBLANE)))
    tm = min(tm, _round_up(B, _SUBLANE))
    grid = (pl.cdiv(B, tm),)   # Pallas masks the partial final block's writes.

    # VMEM guard for the all-weights-resident strategy (v7x: 64 MiB VMEM,
    # 32 MiB scoped default).  ~130 KB here; a compile error at production
    # hidden sizes would mean switching to K/N-tiled weights.
    # TODO(synk): K/N-tiled weight fallback for very large hidden dims on v7x.
    weight_bytes = sum(
        int(prepared[k].size) * prepared[k].dtype.itemsize
        for k in ("w1", "b1", "w2", "b2", "w3", "b3", "w4", "b4"))
    vmem_limit = 32 * 1024 * 1024
    assert 2 * weight_bytes < vmem_limit // 2, (
        "padded weights too large for the VMEM-resident strategy")

    def batch_map(i):        # z / out: advance along batch with the grid
        return (i, 0)

    def resident_map(i):     # weights / biases: same block every step (VMEM-resident)
        return (0, 0)

    in_specs = [
        pl.BlockSpec((tm, z_dim), batch_map),      # z unpadded: last dim == full dim
        pl.BlockSpec((z_dim, d1p), resident_map),
        pl.BlockSpec((1, d1p), resident_map),
        pl.BlockSpec((d1p, d2p), resident_map),
        pl.BlockSpec((1, d2p), resident_map),
        pl.BlockSpec((d2p, d3p), resident_map),
        pl.BlockSpec((1, d3p), resident_map),
        pl.BlockSpec((d3p, out_dim), resident_map),  # out_dim unpadded
        pl.BlockSpec((1, out_dim), resident_map),
    ]
    out_spec = pl.BlockSpec((tm, out_dim), batch_map)

    flops = 2 * B * (z_dim * d1p + d1p * d2p + d2p * d3p + d3p * out_dim)
    bytes_accessed = (B * z_dim * 4) + (B * out_dim * 4) + weight_bytes

    return pl.pallas_call(
        _wgen_kernel,
        out_shape=jax.ShapeDtypeStruct((B, out_dim), jnp.float32),
        grid=grid,
        in_specs=in_specs,
        out_specs=out_spec,
        compiler_params=pltpu.CompilerParams(
            dimension_semantics=("parallel",),
            vmem_limit_bytes=vmem_limit,
        ),
        cost_estimate=pl.CostEstimate(
            flops=flops,
            transcendentals=B * out_dim,
            bytes_accessed=bytes_accessed,
        ),
    )(z, prepared["w1"], prepared["b1"], prepared["w2"], prepared["b2"],
      prepared["w3"], prepared["b3"], prepared["w4"], prepared["b4"])


def init_params(key, z_dim, dim1, dim2, dim3, out_dim):
    """Deterministic init matching PyTorch nn.Linear default:
    U(-1/sqrt(fan_in), 1/sqrt(fan_in)) for both weight and bias."""
    dims = [(z_dim, dim1), (dim1, dim2), (dim2, dim3), (dim3, out_dim)]
    params = {}
    for idx, (fan_in, fan_out) in enumerate(dims, start=1):
        key, kw, kb = jax.random.split(key, 3)
        bound = 1.0 / jnp.sqrt(jnp.float32(fan_in))
        # stored as [in, out] (transpose of PyTorch's [out, in])
        params[f"w{idx}"] = jax.random.uniform(
            kw, (fan_in, fan_out), jnp.float32, -bound, bound)
        params[f"b{idx}"] = jax.random.uniform(
            kb, (1, fan_out), jnp.float32, -bound, bound)
    return params


def reference_forward(z, params, compute_dtype=jnp.bfloat16):
    """Pure-JAX reference using the same dtype policy (bf16 matmul in, f32 acc)."""
    def leaky(x):
        return jnp.where(x >= 0, x, 0.01 * x)

    def fc(x, w, b):
        return jnp.dot(x.astype(compute_dtype), w.astype(compute_dtype),
                       preferred_element_type=jnp.float32) + b

    h = leaky(fc(z, params["w1"], params["b1"]))
    h = leaky(fc(h, params["w2"], params["b2"]))
    h = leaky(fc(h, params["w3"], params["b3"]))
    return 2.0 * jnp.tanh(fc(h, params["w4"], params["b4"]))


if __name__ == "__main__":
    # Small shapes consistent with the module (args.Z_dim / dim1 / dim2 / dim3 / out_dim)
    B, Z_DIM, DIM1, DIM2, DIM3, OUT_DIM = 8, 16, 32, 32, 32, 16

    key = jax.random.PRNGKey(0)
    key, kz = jax.random.split(key)
    z = jax.random.normal(kz, (B, Z_DIM), jnp.float32)

    params = init_params(key, Z_DIM, DIM1, DIM2, DIM3, OUT_DIM)
    prepared = prepare_params(params)          # one-time pad + bf16 cast

    out = wgen_forward(z, prepared)
    out = jax.block_until_ready(out)

    ref = reference_forward(z, params)
    assert out.shape == (B, OUT_DIM)
    assert jnp.allclose(out, ref, atol=2e-3, rtol=2e-3), "mismatch vs reference"

    # Sanity against a full-f32 reference too (bf16 matmuls only deviate slightly).
    ref_f32 = reference_forward(z, params, compute_dtype=jnp.float32)
    assert jnp.max(jnp.abs(out - ref_f32)) < 5e-2, "bf16 drift too large"

    print("KERNEL_OK")
</pallas_src>

<mosaic_0001>
module attributes {stable_mosaic.version = 11 : i64} {
  func.func @_wgen_kernel(%arg0: i32, %arg1: memref<8x16xf32, #tpu.memory_space<vmem>>, %arg2: memref<16x128xbf16, #tpu.memory_space<vmem>>, %arg3: memref<1x128xf32, #tpu.memory_space<vmem>>, %arg4: memref<128x128xbf16, #tpu.memory_space<vmem>>, %arg5: memref<1x128xf32, #tpu.memory_space<vmem>>, %arg6: memref<128x128xbf16, #tpu.memory_space<vmem>>, %arg7: memref<1x128xf32, #tpu.memory_space<vmem>>, %arg8: memref<128x16xbf16, #tpu.memory_space<vmem>>, %arg9: memref<1x16xf32, #tpu.memory_space<vmem>>, %arg10: memref<8x16xf32, #tpu.memory_space<vmem>>) attributes {dimension_semantics = [#tpu.dimension_semantics<parallel>], iteration_bounds = array<i64: 1>, scalar_prefetch = 0 : i64, scratch_operands = 0 : i64, tpu.core_type = #tpu.core_type<tc>, window_params = [{transform_indices = @transform_0, window_bounds = array<i64: 8, 16>}, {pipeline_mode = #tpu.pipeline_mode<synchronous>, transform_indices = @transform_1, window_bounds = array<i64: 16, 128>}, {pipeline_mode = #tpu.pipeline_mode<synchronous>, transform_indices = @transform_2, window_bounds = array<i64: 1, 128>}, {pipeline_mode = #tpu.pipeline_mode<synchronous>, transform_indices = @transform_3, window_bounds = array<i64: 128, 128>}, {pipeline_mode = #tpu.pipeline_mode<synchronous>, transform_indices = @transform_4, window_bounds = array<i64: 1, 128>}, {pipeline_mode = #tpu.pipeline_mode<synchronous>, transform_indices = @transform_5, window_bounds = array<i64: 128, 128>}, {pipeline_mode = #tpu.pipeline_mode<synchronous>, transform_indices = @transform_6, window_bounds = array<i64: 1, 128>}, {pipeline_mode = #tpu.pipeline_mode<synchronous>, transform_indices = @transform_7, window_bounds = array<i64: 128, 16>}, {pipeline_mode = #tpu.pipeline_mode<synchronous>, transform_indices = @transform_8, window_bounds = array<i64: 1, 16>}, {transform_indices = @transform_9, window_bounds = array<i64: 8, 16>}]} {
    %c0 = arith.constant 0 : index
    %c0_0 = arith.constant 0 : index
    %0 = vector.load %arg1[%c0, %c0_0] : memref<8x16xf32, #tpu.memory_space<vmem>>, vector<8x16xf32>
    %1 = arith.truncf %0 : vector<8x16xf32> to vector<8x16xbf16>
    %c0_1 = arith.constant 0 : index
    %c0_2 = arith.constant 0 : index
    %2 = vector.load %arg2[%c0_1, %c0_2] : memref<16x128xbf16, #tpu.memory_space<vmem>>, vector<16x128xbf16>
    %cst = arith.constant dense<0.000000e+00> : vector<8x128xf32>
    %3 = tpu.matmul %1, %2, %cst {dimension_numbers = #tpu.dot_dimension_numbers<[1], [0], [0], [1], [0, 0, 1, 1], [], []>} : vector<8x16xbf16>, vector<16x128xbf16>, vector<8x128xf32> -> vector<8x128xf32>
    %c0_3 = arith.constant 0 : index
    %c0_4 = arith.constant 0 : index
    %4 = vector.load %arg3[%c0_3, %c0_4] : memref<1x128xf32, #tpu.memory_space<vmem>>, vector<1x128xf32>
    %5 = vector.broadcast %4 : vector<1x128xf32> to vector<8x128xf32>
    %6 = arith.addf %3, %5 : vector<8x128xf32>
    %cst_5 = arith.constant 0.000000e+00 : f32
    %7 = vector.broadcast %cst_5 : f32 to vector<8x128xf32>
    %8 = arith.cmpf oge, %6, %7 : vector<8x128xf32>
    %cst_6 = arith.constant 0.00999999977 : f32
    %9 = vector.broadcast %cst_6 : f32 to vector<8x128xf32>
    %10 = arith.mulf %9, %6 : vector<8x128xf32>
    %11 = arith.select %8, %6, %10 : vector<8x128xi1>, vector<8x128xf32>
    %12 = arith.truncf %11 : vector<8x128xf32> to vector<8x128xbf16>
    %c0_7 = arith.constant 0 : index
    %c0_8 = arith.constant 0 : index
    %13 = vector.load %arg4[%c0_7, %c0_8] : memref<128x128xbf16, #tpu.memory_space<vmem>>, vector<128x128xbf16>
    %cst_9 = arith.constant dense<0.000000e+00> : vector<8x128xf32>
    %14 = tpu.matmul %12, %13, %cst_9 {dimension_numbers = #tpu.dot_dimension_numbers<[1], [0], [0], [1], [0, 0, 1, 1], [], []>} : vector<8x128xbf16>, vector<128x128xbf16>, vector<8x128xf32> -> vector<8x128xf32>
    %c0_10 = arith.constant 0 : index
    %c0_11 = arith.constant 0 : index
    %15 = vector.load %arg5[%c0_10, %c0_11] : memref<1x128xf32, #tpu.memory_space<vmem>>, vector<1x128xf32>
    %16 = vector.broadcast %15 : vector<1x128xf32> to vector<8x128xf32>
    %17 = arith.addf %14, %16 : vector<8x128xf32>
    %cst_12 = arith.constant 0.000000e+00 : f32
    %18 = vector.broadcast %cst_12 : f32 to vector<8x128xf32>
    %19 = arith.cmpf oge, %17, %18 : vector<8x128xf32>
    %cst_13 = arith.constant 0.00999999977 : f32
    %20 = vector.broadcast %cst_13 : f32 to vector<8x128xf32>
    %21 = arith.mulf %20, %17 : vector<8x128xf32>
    %22 = arith.select %19, %17, %21 : vector<8x128xi1>, vector<8x128xf32>
    %23 = arith.truncf %22 : vector<8x128xf32> to vector<8x128xbf16>
    %c0_14 = arith.constant 0 : index
    %c0_15 = arith.constant 0 : index
    %24 = vector.load %arg6[%c0_14, %c0_15] : memref<128x128xbf16, #tpu.memory_space<vmem>>, vector<128x128xbf16>
    %cst_16 = arith.constant dense<0.000000e+00> : vector<8x128xf32>
    %25 = tpu.matmul %23, %24, %cst_16 {dimension_numbers = #tpu.dot_dimension_numbers<[1], [0], [0], [1], [0, 0, 1, 1], [], []>} : vector<8x128xbf16>, vector<128x128xbf16>, vector<8x128xf32> -> vector<8x128xf32>
    %c0_17 = arith.constant 0 : index
    %c0_18 = arith.constant 0 : index
    %26 = vector.load %arg7[%c0_17, %c0_18] : memref<1x128xf32, #tpu.memory_space<vmem>>, vector<1x128xf32>
    %27 = vector.broadcast %26 : vector<1x128xf32> to vector<8x128xf32>
    %28 = arith.addf %25, %27 : vector<8x128xf32>
    %cst_19 = arith.constant 0.000000e+00 : f32
    %29 = vector.broadcast %cst_19 : f32 to vector<8x128xf32>
    %30 = arith.cmpf oge, %28, %29 : vector<8x128xf32>
    %cst_20 = arith.constant 0.00999999977 : f32
    %31 = vector.broadcast %cst_20 : f32 to vector<8x128xf32>
    %32 = arith.mulf %31, %28 : vector<8x128xf32>
    %33 = arith.select %30, %28, %32 : vector<8x128xi1>, vector<8x128xf32>
    %34 = arith.truncf %33 : vector<8x128xf32> to vector<8x128xbf16>
    %c0_21 = arith.constant 0 : index
    %c0_22 = arith.constant 0 : index
    %35 = vector.load %arg8[%c0_21, %c0_22] : memref<128x16xbf16, #tpu.memory_space<vmem>>, vector<128x16xbf16>
    %cst_23 = arith.constant dense<0.000000e+00> : vector<8x16xf32>
    %36 = tpu.matmul %34, %35, %cst_23 {dimension_numbers = #tpu.dot_dimension_numbers<[1], [0], [0], [1], [0, 0, 1, 1], [], []>} : vector<8x128xbf16>, vector<128x16xbf16>, vector<8x16xf32> -> vector<8x16xf32>
    %c0_24 = arith.constant 0 : index
    %c0_25 = arith.constant 0 : index
    %37 = vector.load %arg9[%c0_24, %c0_25] : memref<1x16xf32, #tpu.memory_space<vmem>>, vector<1x16xf32>
    %38 = vector.broadcast %37 : vector<1x16xf32> to vector<8x16xf32>
    %39 = arith.addf %36, %38 : vector<8x16xf32>
    %40 = math.tanh %39 : vector<8x16xf32>
    %cst_26 = arith.constant 2.000000e+00 : f32
    %41 = vector.broadcast %cst_26 : f32 to vector<8x16xf32>
    %42 = arith.mulf %41, %40 : vector<8x16xf32>
    %c0_27 = arith.constant 0 : index
    %c0_28 = arith.constant 0 : index
    %43 = vector.load %arg10[%c0_27, %c0_28] : memref<8x16xf32, #tpu.memory_space<vmem>>, vector<8x16xf32>
    tpu.vector_store %arg10[%c0_27, %c0_28], %42 {strides = array<i32>} : memref<8x16xf32, #tpu.memory_space<vmem>>, vector<8x16xf32>,
    return
  }
  func.func @transform_0(%arg0: i32) -> (i32, i32) {
    %c0_i32 = arith.constant 0 : i32
    %c0_i32_0 = arith.constant 0 : i32
    return %arg0, %c0_i32 : i32, i32
  }
  func.func @transform_1(%arg0: i32) -> (i32, i32) {
    %c0_i32 = arith.constant 0 : i32
    %c0_i32_0 = arith.constant 0 : i32
    %c0_i32_1 = arith.constant 0 : i32
    return %c0_i32, %c0_i32_0 : i32, i32
  }
  func.func @transform_2(%arg0: i32) -> (i32, i32) {
    %c0_i32 = arith.constant 0 : i32
    %c0_i32_0 = arith.constant 0 : i32
    %c0_i32_1 = arith.constant 0 : i32
    return %c0_i32, %c0_i32_0 : i32, i32
  }
  func.func @transform_3(%arg0: i32) -> (i32, i32) {
    %c0_i32 = arith.constant 0 : i32
    %c0_i32_0 = arith.constant 0 : i32
    %c0_i32_1 = arith.constant 0 : i32
    return %c0_i32, %c0_i32_0 : i32, i32
  }
  func.func @transform_4(%arg0: i32) -> (i32, i32) {
    %c0_i32 = arith.constant 0 : i32
    %c0_i32_0 = arith.constant 0 : i32
    %c0_i32_1 = arith.constant 0 : i32
    return %c0_i32, %c0_i32_0 : i32, i32
  }
  func.func @transform_5(%arg0: i32) -> (i32, i32) {
    %c0_i32 = arith.constant 0 : i32
    %c0_i32_0 = arith.constant 0 : i32
    %c0_i32_1 = arith.constant 0 : i32
    return %c0_i32, %c0_i32_0 : i32, i32
  }
  func.func @transform_6(%arg0: i32) -> (i32, i32) {
    %c0_i32 = arith.constant 0 : i32
    %c0_i32_0 = arith.constant 0 : i32
    %c0_i32_1 = arith.constant 0 : i32
    return %c0_i32, %c0_i32_0 : i32, i32
  }
  func.func @transform_7(%arg0: i32) -> (i32, i32) {
    %c0_i32 = arith.constant 0 : i32
    %c0_i32_0 = arith.constant 0 : i32
    %c0_i32_1 = arith.constant 0 : i32
    return %c0_i32, %c0_i32_0 : i32, i32
  }
  func.func @transform_8(%arg0: i32) -> (i32, i32) {
    %c0_i32 = arith.constant 0 : i32
    %c0_i32_0 = arith.constant 0 : i32
    %c0_i32_1 = arith.constant 0 : i32
    return %c0_i32, %c0_i32_0 : i32, i32
  }
  func.func @transform_9(%arg0: i32) -> (i32, i32) {
    %c0_i32 = arith.constant 0 : i32
    %c0_i32_0 = arith.constant 0 : i32
    return %arg0, %c0_i32 : i32, i32
  }
}

</mosaic_0001>

<bundles_post_ra>
// kernel: tpu_custom_call.1
= control target key start
LH: loop header
LB: loop body
LE: loop exit
PB: predicated region body
PF: predicated region fallthrough
CT: control target
= control target key end

     0   :  { %14 = vsyncpa [#allocation3], 0  ;;  %s717_s0 = inlined_call_operand.vmem [shape: f32[8,16], index: 0, kind: input, shape index: {}]   ;;  %s718_s1 = inlined_call_operand.hbm [shape: bf16[16,128], index: 1, kind: input, shape index: {}]   ;;  %s719_s2 = inlined_call_operand.vmem [shape: f32[1,128], index: 2, kind: input, shape index: {}]   ;;  %s720_s3 = inlined_call_operand.vmem [shape: bf16[128,128], index: 3, kind: input, shape index: {}]   ;;  %s721_s4 = inlined_call_operand.vmem [shape: f32[1,128], index: 4, kind: input, shape index: {}]   ;;  %s722_s5 = inlined_call_operand.hbm [shape: bf16[128,128], index: 5, kind: input, shape index: {}]   ;;  %s723_s6 = inlined_call_operand.vmem [shape: f32[1,128], index: 6, kind: input, shape index: {}]   ;;  %s724_s7 = inlined_call_operand.vmem [shape: bf16[128,16], index: 7, kind: input, shape index: {}]   ;;  %s725_s8 = inlined_call_operand.vmem [shape: f32[1,16], index: 8, kind: input, shape index: {}]   ;;  %s726_s9 = inlined_call_operand.hbm [shape: f32[8,16], index: 9, kind: output, shape index: {}]  }
   0x1   :  { %15 = vsyncpa [#allocation6], 0 }
   0x2   :  { %16 = vsyncpa [#allocation4], 0  ;;  %s23_s11 = sshll.u32 %s718_s1, 4  ;;  %s588_s12 = smov [#allocation2]   ;;  %s24_s11 = int_to_ptr.hbm [resolvable:$true] %s23_s11 }
   0x3   :  { %s25_s13 = sshll.u32 %s588_s12, 4  ;;  %s42_s16 = sshll.u32 %s722_s5, 4  ;;  %s26_s13 = int_to_ptr.vmem [resolvable:$true] %s25_s13  ;;  %s43_s16 = int_to_ptr.hbm [resolvable:$true] %s42_s16 }
   0x4   :  { %s589_s17 = smov 64   ;;  %s590_s18 = smov 4  }
   0x5   :  { %31 = dma.hbm_to_vmem [thread:$0]  %s24_s11, 128, %s26_s13, [#allocation3], %s589_s17, %s589_s17, %s590_s18  }
   0x6   :  { %s591_s19 = smov [#allocation5]  }
   0x7   :  { %s44_s20 = sshll.u32 %s591_s19, 4  ;;  %s45_s20 = int_to_ptr.vmem [resolvable:$true] %s44_s20 }
   0x8   :  { %50 = dma.hbm_to_vmem [thread:$0]  %s43_s16, 1024, %s45_s20, [#allocation6], %s589_s17, %s589_s17, %s590_s18  }
   0x9   :  { %582 = dma.done.wait [#allocation3], 128  }
   0xa   :  { %583 = vsyncadd [#allocation3], 4294967168 }
   0xb   :  { %584 = dma.done.wait [#allocation6], 1024  }
   0xc   :  { %585 = vsyncadd [#allocation6], 4294966272  ;;  %v474_v0 = vld [vmem:[#allocation2] sm:$0xff]  ;;  %v482_v2 = vld [vmem:[%s720_s3 + $0x38] sm:$0xff]  ;;  %vm80_vm0 = vcmask 130048  }
   0xd   :  { %v66_v1 = vld [vmem:[%s717_s0] sm:$0xff]  ;;  %91 = vmatpush.bf16.msra.mxu0 %v474_v0  ;;  %169 = vmatpush.bf16.msra.mxu1 %v482_v2  ;;  %v481_v4 = vld [vmem:[%s720_s3 + $0x30] sm:$0xff]  ;;  %v480_v5 = vld [vmem:[%s720_s3 + $0x28] sm:$0xff] }
   0xe   :  { %v67_v3 = vpack.c.bf16 %v66_v1, %v66_v1  ;;  %v479_v6 = vld [vmem:[%s720_s3 + $0x20] sm:$0xff]  ;;  %v478_v7 = vld [vmem:[%s720_s3 + $0x18] sm:$0xff]  ;;  %v477_v8 = vld [vmem:[%s720_s3 + $0x10] sm:$0xff] }
   0xf   :  { %v476_v9 = vld [vmem:[%s720_s3 + $0x8] sm:$0xff]  ;;  %v475_v10 = vld [vmem:[%s720_s3] sm:$0xff]  ;;  %v489_v12 = vld [vmem:[#allocation5 + $0x30] sm:$0xff] }
  0x10   :  { %377 = vmatmul.msk.bf16.vlgmr.msra.gmra.mxu0 %vm80_vm0, %v67_v3  ;;  %v490_v11 = vld [vmem:[#allocation5 + $0x38] sm:$0xff]  ;;  %v488_v13 = vld [vmem:[#allocation5 + $0x28] sm:$0xff]  ;;  %v487_v14 = vld [vmem:[#allocation5 + $0x20] sm:$0xff] }
  0x11   :  { %170 = vmatpush.bf16.msra.mxu1 %v481_v4  ;;  %254 = vmatpush.bf16.msra.mxu2 %v490_v11  ;;  %v486_v15 = vld [vmem:[#allocation5 + $0x18] sm:$0xff]  ;;  %v485_v16 = vld [vmem:[#allocation5 + $0x10] sm:$0xff]  ;;  %v484_v24 = vld [vmem:[#allocation5 + $0x8] sm:$0xff] }
  0x12   :  { %v504_v17 = vld [vmem:[%s719_s2] ss:$0 sm:$0xff]  ;;  %v483_v25 = vld [vmem:[#allocation5] sm:$0xff]  ;;  %v498_v26 = vld [vmem:[%s724_s7 + $0x38] sm:$0xff] }
  0x13   :  { %339 = vmatpush.bf16.msra.mxu3 %v498_v26  ;;  %v497_v27 = vld [vmem:[%s724_s7 + $0x30] sm:$0xff]  ;;  %v496_v28 = vld [vmem:[%s724_s7 + $0x28] sm:$0xff]  ;;  %v495_v29 = vld [vmem:[%s724_s7 + $0x20] sm:$0xff] }
  0x14   :  { %v494_v30 = vld [vmem:[%s724_s7 + $0x18] sm:$0xff]  ;;  %v493_v31 = vld [vmem:[%s724_s7 + $0x10] sm:$0xff]  ;;  %v505_v32 = vld [vmem:[%s721_s4] ss:$0 sm:$0xff] }
  0x15   :  { %171 = vmatpush.bf16.msra.mxu1 %v480_v5  ;;  %255 = vmatpush.bf16.msra.mxu2 %v489_v12  ;;  %v492_v39 = vld [vmem:[%s724_s7 + $0x8] sm:$0xff]  ;;  %v491_v40 = vld [vmem:[%s724_s7] sm:$0xff]  ;;  %s592_s7 = smov [#allocation7]  }
  0x16   :  { %v506_v41 = vld [vmem:[%s723_s6] ss:$0 sm:$0xff]  ;;  %s360_s12 = sshll.u32 %s592_s7, 4  ;;  %s362_s6 = sshll.u32 %s726_s9, 4  ;;  %s361_s12 = int_to_ptr.vmem [resolvable:$true] %s360_s12  ;;  %s363_s6 = int_to_ptr.hbm [resolvable:$true] %s362_s6 }
  0x17   :  { %340 = vmatpush.bf16.msra.mxu3 %v497_v27  ;;  %v507_v48 = vld [vmem:[%s725_s8] ss:$0 sm:$0xff] }
  0x19   :  { %172 = vmatpush.bf16.msra.mxu1 %v479_v6  ;;  %256 = vmatpush.bf16.msra.mxu2 %v488_v13 }
  0x1b   :  { %341 = vmatpush.bf16.msra.mxu3 %v496_v28 }
  0x1d   :  { %173 = vmatpush.bf16.msra.mxu1 %v478_v7  ;;  %257 = vmatpush.bf16.msra.mxu2 %v487_v14 }
  0x1f   :  { %342 = vmatpush.bf16.msra.mxu3 %v495_v29 }
  0x21   :  { %174 = vmatpush.bf16.msra.mxu1 %v477_v8  ;;  %258 = vmatpush.bf16.msra.mxu2 %v486_v15 }
  0x23   :  { %343 = vmatpush.bf16.msra.mxu3 %v494_v30 }
  0x25   :  { %175 = vmatpush.bf16.msra.mxu1 %v476_v9  ;;  %259 = vmatpush.bf16.msra.mxu2 %v485_v16 }
  0x27   :  { %344 = vmatpush.bf16.msra.mxu3 %v493_v31 }
  0x29   :  { %176 = vmatpush.bf16.msra.mxu1 %v475_v10  ;;  %260 = vmatpush.bf16.msra.mxu2 %v484_v24 }
  0x2b   :  { %345 = vmatpush.bf16.msra.mxu3 %v492_v39 }
  0x2d   :  { %261 = vmatpush.bf16.msra.mxu2 %v483_v25 }
  0x2f   :  { %346 = vmatpush.bf16.msra.mxu3 %v491_v40 }
  0x8d   :  { %v93_v18 = vpop.f32.mrf.mxu0 }
  0x8e   :  { %v94_v19 = vadd.f32 %v504_v17, %v93_v18 }
  0x90   :  { %v98_v20 = vmul.f32 0.01, %v94_v19  ;;  %vm97_vm1 = vcmp.ge.f32.partialorder %v94_v19, 0.0 }
  0x92   :  { %v99_v21 = vsel %vm97_vm1, %v94_v19, %v98_v20 }
  0x93   :  { %v100_v22 = vpack.c.bf16 %v99_v21, %v99_v21 }
  0x95   :  { %v95_v23 = vpop.f32.mrf.mxu0  ;;  %177 = vmatmul.bf16.vlgmr.msra.gmra.mxu1 %v100_v22 }
 0x112   :  { %v178_v33 = vpop.f32.mrf.mxu1 }
 0x113   :  { %v179_v34 = vadd.f32 %v505_v32, %v178_v33 }
 0x115   :  { %v183_v35 = vmul.f32 0.01, %v179_v34  ;;  %vm182_vm2 = vcmp.ge.f32.partialorder %v179_v34, 0.0 }
 0x117   :  { %v184_v36 = vsel %vm182_vm2, %v179_v34, %v183_v35 }
 0x118   :  { %v185_v37 = vpack.c.bf16 %v184_v36, %v184_v36 }
 0x11a   :  { %v180_v38 = vpop.f32.mrf.mxu1  ;;  %262 = vmatmul.bf16.vlgmr.msra.gmra.mxu2 %v185_v37 }
 0x19d   :  { %v263_v42 = vpop.f32.mrf.mxu2 }
 0x19e   :  { %v264_v43 = vadd.f32 %v506_v41, %v263_v42 }
 0x1a0   :  { %v268_v44 = vmul.f32 0.01, %v264_v43  ;;  %vm267_vm3 = vcmp.ge.f32.partialorder %v264_v43, 0.0 }
 0x1a2   :  { %v269_v45 = vsel %vm267_vm3, %v264_v43, %v268_v44 }
 0x1a3   :  { %v270_v46 = vpack.c.bf16 %v269_v45, %v269_v45 }
 0x1a5   :  { %v265_v47 = vpop.f32.mrf.mxu2  ;;  %347 = vmatmul.bf16.vlgmr.msra.gmra.mxu3 %v270_v46 }
 0x228   :  { %v348_v49 = vpop.f32.mrf.mxu3 }
 0x229   :  { %v349_v50 = vadd.f32 %v507_v48, %v348_v49 }
 0x22b   :  { %508 = vtanh.f32 %v349_v50 }
 0x230   :  { %v350_v51 = vpop.f32.mrf.mxu3 }
 0x231   :  { %v509_v52 = vpop.eup %508 }
 0x232   :  { %v353_v53 = vmul.f32 2.0, %v509_v52 }
 0x234   :  { %354 = vst.msk [vmem:[#allocation7] sm:$0xff] %vm80_vm0, %v353_v53 }
 0x235   :  { %365 = dma.vmem_to_hbm [thread:$0]  %s361_s12, 128, %s363_s6, [#allocation4]  }
 0x236   :  { %586 = dma.done.wait [#allocation4], 128  }
 0x237   :  { %587 = vsyncadd [#allocation4], 4294967168 }
 0x238   :  { %370 = vsyncpa [#allocation3], 1 }
 0x239   :  { %371 = vsyncpa [#allocation6], 1 }
 0x23a   :  { %372 = vsyncpa [#allocation4], 1 }

</bundles_post_ra>
